<compile_context>
chip_gen: v6e
topology: v6e:2x2x1
jax: 0.10.0
libtpu: 0.0.40
codegen_flags: <defaults>
</compile_context>

<pallas_src>
import functools
import math

import numpy as np
import jax
import jax.numpy as jnp
from jax import lax
from jax.experimental import pallas as pl
from jax.experimental.pallas import tpu as pltpu


def _round_up(x, m):
    return ((x + m - 1) // m) * m


def _cdiv(a, b):
    return -(-a // b)


@functools.lru_cache(maxsize=None)
def _vmem_limit_bytes():
    """~80% of physical per-core VMEM (~51 MiB on v7x, ~102 MiB on v5e/v6e)."""
    limit = 64 * 1024 * 1024                       # conservative fallback
    try:
        cap = int(pltpu.get_tpu_info().vmem_capacity_bytes)
        if cap > 0:
            limit = int(cap * 0.8)
    except Exception:
        pass
    return int(max(32 * 1024 * 1024, min(limit, 112 * 1024 * 1024)))


_UNROLL_MAX = 16      # fully unroll the in-kernel recurrence for chunks this short


def _pick_time_chunk(T, N_b, N_u, max_bytes=4 * 1024 * 1024, max_frames=64):
    """Frames per time chunk; Tc*N_b is kept a multiple of 8 (sublane-dense)."""
    step = 8 // math.gcd(N_b, 8)
    frames_by_bytes = max(1, max_bytes // max(4 * N_b * N_u, 1))
    limit = max(step, min(max_frames, frames_by_bytes))
    return max(step, min(_round_up(T, step), _round_up(limit, step)))


# ----------------------------------------------------------------------------
# ESN kernels: grid = (channel [parallel], time-chunk [arbitrary])
# ----------------------------------------------------------------------------

def _esn_fit_kernel(alpha, trans_len, T, Tc, N_b,
                    seq_ref, win_ref, w_ref, g_ref, dx_ref,
                    x_scr, xstage, p_scr):
    """One (channel, time-chunk) grid step of the leaky-ESN ridge statistics.

    seq_ref : (Tc*N_b, N_u)   frames k*Tc .. k*Tc+Tc-1, batch-major per frame
    win_ref : (N_u, N_x)      W_in^T
    w_ref   : (N_x, N_x)      W^T
    g_ref   : (N_x, N_x)      accumulator  G  = sum_t x_t^T x_t
    dx_ref  : (N_u, N_x)      accumulator  DX = sum_t d_t^T x_t   (d_t = seq[t+1])
    x_scr   : (N_b, N_x)      reservoir state carried across chunks
    xstage  : (Tc*N_b, N_x)   teacher-aligned staged states for this chunk
    p_scr   : (Tc*N_b, N_x)   hoisted input projection of the whole chunk
    """
    k = pl.program_id(1)

    @pl.when(k == 0)
    def _init():
        x_scr[...] = jnp.zeros_like(x_scr)
        g_ref[...] = jnp.zeros_like(g_ref)
        dx_ref[...] = jnp.zeros_like(dx_ref)

    # (1) Hoist the K=N_u input projection off the serial chain: one MXU matmul
    #     for the whole chunk instead of one per timestep.
    p_scr[...] = jnp.dot(seq_ref[...], win_ref[...],
                         preferred_element_type=jnp.float32)

    t0 = k * Tc

    def _step(j):
        t = t0 + j                             # global frame index
        r = j * N_b
        if not isinstance(r, int):
            r = pl.multiple_of(r, N_b)
        x = x_scr[...]
        # Teacher seq[t] pairs with the state *before* this update (x_{t-1}).
        # Stage it pre-masked so the chunked Gram below needs no extra masking.
        valid = jnp.where(jnp.logical_and(t >= trans_len + 1, t <= T - 1),
                          1.0, 0.0).astype(jnp.float32)
        xstage[pl.ds(r, N_b), :] = x * valid

        @pl.when(t < T - 1)                    # frames 0..T-2 drive the recurrence
        def _update():
            pre = p_scr[pl.ds(r, N_b), :] + jnp.dot(
                x, w_ref[...], preferred_element_type=jnp.float32)
            x_scr[...] = (1.0 - alpha) * x + alpha * jnp.tanh(pre)

    if Tc <= _UNROLL_MAX:
        for j in range(Tc):                    # fully unrolled recurrence
            _step(j)
    else:
        pl.loop(0, Tc)(_step)

    # (2) Chunked Gram / cross-covariance: ONE K = Tc*N_b contraction per chunk
    #     and one accumulator read-modify-write per chunk (not per step).
    xs = xstage[...]
    g_ref[...] += lax.dot_general(xs, xs, (((0,), (0,)), ((), ())),
                                  preferred_element_type=jnp.float32)
    dx_ref[...] += lax.dot_general(seq_ref[...], xs, (((0,), (0,)), ((), ())),
                                   preferred_element_type=jnp.float32)


def esn_fit_gram(seq, win_t, w_t, alpha, trans_len=0):
    """seq: (C,T,N_b,N_u); win_t: (C,N_u,N_x); w_t: (C,N_x,N_x).
    Returns G (C,N_x,N_x) and DX (C,N_u,N_x)."""
    C, T, N_b, N_u = seq.shape
    N_x = w_t.shape[-1]
    Tc = _pick_time_chunk(T, N_b, N_u)
    KC = _cdiv(T, Tc)
    Tp = KC * Tc
    if Tp != T:
        seq = jnp.pad(seq, ((0, 0), (0, Tp - T), (0, 0), (0, 0)))
    seq2 = seq.reshape(C, Tp * N_b, N_u)       # frame-major rows (free reshape)
    FB = Tc * N_b

    kernel = functools.partial(_esn_fit_kernel, float(alpha), int(trans_len),
                               int(T), int(Tc), int(N_b))
    return pl.pallas_call(
        kernel,
        out_shape=(jax.ShapeDtypeStruct((C, N_x, N_x), jnp.float32),
                   jax.ShapeDtypeStruct((C, N_u, N_x), jnp.float32)),
        grid_spec=pltpu.PrefetchScalarGridSpec(
            num_scalar_prefetch=0,
            grid=(C, KC),
            in_specs=[pl.BlockSpec((None, FB, N_u), lambda c, k: (c, k, 0)),
                      pl.BlockSpec((None, N_u, N_x), lambda c, k: (c, 0, 0)),
                      pl.BlockSpec((None, N_x, N_x), lambda c, k: (c, 0, 0))],
            out_specs=(pl.BlockSpec((None, N_x, N_x), lambda c, k: (c, 0, 0)),
                       pl.BlockSpec((None, N_u, N_x), lambda c, k: (c, 0, 0))),
            scratch_shapes=[pltpu.VMEM((N_b, N_x), jnp.float32),
                            pltpu.VMEM((FB, N_x), jnp.float32),
                            pltpu.VMEM((FB, N_x), jnp.float32)]),
        compiler_params=pltpu.CompilerParams(
            dimension_semantics=("parallel", "arbitrary"),
            vmem_limit_bytes=_vmem_limit_bytes()),
    )(seq2, win_t, w_t)


def _esn_fwd_kernel(alpha, T, Tc, N_b,
                    seq_ref, win_ref, w_ref, wout_ref, y_ref, x_scr, p_scr):
    """Recurrence for one (channel, time-chunk); last chunk emits the readout."""
    k = pl.program_id(1)

    @pl.when(k == 0)
    def _init():
        x_scr[...] = jnp.zeros_like(x_scr)

    # Hoisted input projection for the whole chunk.
    p_scr[...] = jnp.dot(seq_ref[...], win_ref[...],
                         preferred_element_type=jnp.float32)
    t0 = k * Tc

    def _step(j):
        t = t0 + j

        @pl.when(t < T)
        def _update():
            r = j * N_b
            if not isinstance(r, int):
                r = pl.multiple_of(r, N_b)
            x = x_scr[...]
            pre = p_scr[pl.ds(r, N_b), :] + jnp.dot(
                x, w_ref[...], preferred_element_type=jnp.float32)
            x_scr[...] = (1.0 - alpha) * x + alpha * jnp.tanh(pre)

    if Tc <= _UNROLL_MAX:
        for j in range(Tc):
            _step(j)
    else:
        pl.loop(0, Tc)(_step)

    @pl.when(k == pl.num_programs(1) - 1)
    def _readout():
        y_ref[...] = jnp.dot(x_scr[...], wout_ref[...],
                             preferred_element_type=jnp.float32)


def esn_forward_last(seq, win_t, w_t, wout_t, alpha):
    """seq: (C,T,N_b,N_u) -> last-step readout (C,N_b,N_y)."""
    C, T, N_b, N_u = seq.shape
    N_x = w_t.shape[-1]
    N_y = wout_t.shape[-1]
    Tc = _pick_time_chunk(T, N_b, N_u)
    KC = _cdiv(T, Tc)
    Tp = KC * Tc
    if Tp != T:
        seq = jnp.pad(seq, ((0, 0), (0, Tp - T), (0, 0), (0, 0)))
    seq2 = seq.reshape(C, Tp * N_b, N_u)
    FB = Tc * N_b

    kernel = functools.partial(_esn_fwd_kernel, float(alpha), int(T), int(Tc),
                               int(N_b))
    return pl.pallas_call(
        kernel,
        out_shape=jax.ShapeDtypeStruct((C, N_b, N_y), jnp.float32),
        grid_spec=pltpu.PrefetchScalarGridSpec(
            num_scalar_prefetch=0,
            grid=(C, KC),
            in_specs=[pl.BlockSpec((None, FB, N_u), lambda c, k: (c, k, 0)),
                      pl.BlockSpec((None, N_u, N_x), lambda c, k: (c, 0, 0)),
                      pl.BlockSpec((None, N_x, N_x), lambda c, k: (c, 0, 0)),
                      pl.BlockSpec((None, N_x, N_y), lambda c, k: (c, 0, 0))],
            out_specs=pl.BlockSpec((None, N_b, N_y), lambda c, k: (c, 0, 0)),
            scratch_shapes=[pltpu.VMEM((N_b, N_x), jnp.float32),
                            pltpu.VMEM((FB, N_x), jnp.float32)]),
        compiler_params=pltpu.CompilerParams(
            dimension_semantics=("parallel", "arbitrary"),
            vmem_limit_bytes=_vmem_limit_bytes()),
    )(seq2, win_t, w_t, wout_t)


# ----------------------------------------------------------------------------
# Bilinear resize kernel (batched: Mb images per grid step)
# ----------------------------------------------------------------------------

def _resize_kernel(rh_ref, rwt_ref, img_ref, out_ref):
    Mb, H, W = img_ref.shape
    toH = rh_ref.shape[0]
    toW = rwt_ref.shape[1]
    # W-resize as one lane-dense 2D matmul: (Mb*H, W) @ (W, toW)
    tmp = jnp.dot(img_ref[...].reshape(Mb * H, W), rwt_ref[...],
                  preferred_element_type=jnp.float32).reshape(Mb, H, toW)
    # H-resize as a batched matmul: (Mb, toH, H) @ (Mb, H, toW)
    rh_b = jnp.broadcast_to(rh_ref[...][None], (Mb, toH, H))
    out_ref[...] = lax.dot_general(
        rh_b, tmp, (((2,), (1,)), ((0,), (0,))),
        preferred_element_type=jnp.float32)


def pallas_resize_stack(imgs, rh, rwt, block_m=256):
    """Bilinear resize of a stack of images as two matmuls per image.

    imgs: (M, H, W); rh: (toH, H); rwt: (W, toW)  -> (M, toH, toW)
    # TODO(synk): for very small target resolutions toW < 128 the output stores
    # are lane-masked; padding toW to 128 would write 3-6x more HBM bytes, so
    # the masked-but-smaller layout is kept.
    """
    M, H, W = imgs.shape
    toH, toW = rh.shape[0], rwt.shape[1]
    # Large batch tiles amortize the ~0.35 us per-grid-step overhead, bounded
    # so the double-buffered in/out blocks stay well under the VMEM budget.
    per_img = 4 * (H * W + H * toW + toH * toW)
    Mb = int(max(1, min(block_m, M, (8 * 1024 * 1024) // max(2 * per_img, 1))))
    Mp = _round_up(M, Mb)
    if Mp != M:
        imgs = jnp.pad(imgs, ((0, Mp - M), (0, 0), (0, 0)))
    out = pl.pallas_call(
        _resize_kernel,
        out_shape=jax.ShapeDtypeStruct((Mp, toH, toW), jnp.float32),
        grid_spec=pltpu.PrefetchScalarGridSpec(
            num_scalar_prefetch=0,
            grid=(Mp // Mb,),
            in_specs=[pl.BlockSpec((toH, H), lambda m: (0, 0)),
                      pl.BlockSpec((W, toW), lambda m: (0, 0)),
                      pl.BlockSpec((Mb, H, W), lambda m: (m, 0, 0))],
            out_specs=pl.BlockSpec((Mb, toH, toW), lambda m: (m, 0, 0))),
        compiler_params=pltpu.CompilerParams(
            dimension_semantics=("parallel",),
            vmem_limit_bytes=_vmem_limit_bytes()),
    )(rh, rwt, imgs)
    return out[:M] if Mp != M else out


# ----------------------------------------------------------------------------
# Lane-dense per-channel image fusion (gridded over the batch)
# ----------------------------------------------------------------------------

def _fusion_kernel(ka_ref, kb_ref, a_ref, b_ref, o_ref):
    fused = ka_ref[...] * a_ref[...] + kb_ref[...] * b_ref[...]
    o_ref[...] = jnp.clip(fused, 0.0, 1.0)


def image_fusion(k, img_a, img_b):
    """out[:, c] = clip(k[c,0]*a[:,c] + k[c,1]*b[:,c], 0, 1).

    k: (C, 2); img_a, img_b: (N_b, C, H, W) at the same resolution.  Lane-dense
    on the flattened (C, H*W) per-sample layout, one batch element per grid
    step so the VMEM footprint is bounded and the DMAs pipeline.
    """
    N_b, C, H, W = img_a.shape
    HW = H * W
    a = img_a.reshape(N_b, C, HW)
    b = img_b.reshape(N_b, C, HW)
    ka = k[:, 0].reshape(C, 1)
    kb = k[:, 1].reshape(C, 1)
    out = pl.pallas_call(
        _fusion_kernel,
        out_shape=jax.ShapeDtypeStruct((N_b, C, HW), jnp.float32),
        grid_spec=pltpu.PrefetchScalarGridSpec(
            num_scalar_prefetch=0,
            grid=(N_b,),
            in_specs=[pl.BlockSpec((C, 1), lambda n: (0, 0)),
                      pl.BlockSpec((C, 1), lambda n: (0, 0)),
                      pl.BlockSpec((None, C, HW), lambda n: (n, 0, 0)),
                      pl.BlockSpec((None, C, HW), lambda n: (n, 0, 0))],
            out_specs=pl.BlockSpec((None, C, HW), lambda n: (n, 0, 0))),
        compiler_params=pltpu.CompilerParams(
            dimension_semantics=("parallel",),
            vmem_limit_bytes=_vmem_limit_bytes()),
    )(ka, kb, a, b)
    return out.reshape(N_b, C, H, W)


# ----------------------------------------------------------------------------
# Glue: bilinear interpolation matrices, ESN parameter init
# ----------------------------------------------------------------------------

@functools.lru_cache(maxsize=None)
def _bilinear_matrix(src, dst):
    """(dst, src) bilinear interpolation matrix, align_corners=False.

    # TODO(synk): recent torchvision F.resize applies antialiasing for tensor
    # bilinear downscaling by default; plain (non-antialiased) bilinear is used.
    """
    m = np.zeros((dst, src), dtype=np.float32)
    if src == 1:
        m[:, 0] = 1.0
        return m
    scale = src / dst
    for i in range(dst):
        x = (i + 0.5) * scale - 0.5
        x = min(max(x, 0.0), src - 1.0)
        i0 = int(np.floor(x))
        i1 = min(i0 + 1, src - 1)
        w = x - i0
        m[i, i0] += 1.0 - w
        m[i, i1] += w
    return m


def init_esn_params(rng, n_u, n_x, n_x_pad, density, input_scale, rho):
    """Standard leaky-ESN init (dense uniform W_in, sparse W scaled to spectral
    radius rho), zero-padded to n_x_pad reservoir units.  Padded units have
    zero weights and start at 0, so they remain exactly 0 forever."""
    win = rng.uniform(-input_scale, input_scale, size=(n_x, n_u)).astype(np.float32)
    w = rng.uniform(-1.0, 1.0, size=(n_x, n_x))
    mask = rng.random((n_x, n_x)) < density
    w = w * mask
    sr = np.abs(np.linalg.eigvals(w)).max()
    if sr > 0:
        w = w * (rho / sr)
    w = w.astype(np.float32)
    win_t = np.zeros((n_u, n_x_pad), dtype=np.float32)
    win_t[:, :n_x] = win.T
    w_t = np.zeros((n_x_pad, n_x_pad), dtype=np.float32)
    w_t[:n_x, :n_x] = w.T
    return win_t, w_t


# ----------------------------------------------------------------------------
# Modules (plain Python containers; compute routed through the Pallas kernels)
# ----------------------------------------------------------------------------

class NextFramePrediction:
    """NextFramePredictionModule: one leaky ESN per channel; all channels run
    inside a single pallas_call (channel = parallel grid axis).

    # TODO(synk): the reference repo's ESN class was not provided; a standard
    # leaky-integrator ESN with ridge-regression readout is implemented, with
    # the hyperparameters given in NextFramePredictionModule.__init__.
    """

    def __init__(self, H, W, C, node_num, seed,
                 density=0.05, input_scale=1.0, rho=0.95,
                 leaking_rate=0.95, regularization_rate=1.0, trans_len=0):
        self.H, self.W, self.C = H, W, C
        self.n_u = H * W
        self.n_x = _round_up(node_num, 128)   # lane-dense reservoir (exact padding)
        self.alpha = leaking_rate
        self.reg = regularization_rate
        self.trans_len = trans_len
        win_list, w_list = [], []
        for c in range(C):
            rng = np.random.default_rng(10_000 * seed + c)
            win_t, w_t = init_esn_params(rng, self.n_u, node_num, self.n_x,
                                         density, input_scale, rho)
            win_list.append(win_t)
            w_list.append(w_t)
        self.win_t = jnp.asarray(np.stack(win_list))            # (C, N_u, N_x)
        self.w_t = jnp.asarray(np.stack(w_list))                # (C, N_x, N_x)
        self.wout_t = jnp.zeros((C, self.n_x, self.n_u), jnp.float32)

    def _to_seq(self, data):
        N_b, T, C, H, W = data.shape
        return jnp.transpose(data, (2, 1, 0, 3, 4)).reshape(C, T, N_b, self.n_u)

    def _fit_seq(self, seq):
        G, DX = esn_fit_gram(seq, self.win_t, self.w_t, self.alpha,
                             self.trans_len)
        # TODO(synk): the ridge (Tikhonov) linear solve has no clean Pallas
        # equivalent; batched over channels in plain JAX.
        ridge = G + self.reg * jnp.eye(self.n_x, dtype=jnp.float32)[None]
        self.wout_t = jnp.linalg.solve(ridge, jnp.transpose(DX, (0, 2, 1)))

    def _forward_seq(self, seq, N_b):
        y_last = esn_forward_last(seq, self.win_t, self.w_t, self.wout_t,
                                  self.alpha)                # (C, N_b, N_y)
        return y_last.reshape(self.C, N_b, self.H, self.W).transpose(1, 0, 2, 3)

    def fit(self, data):                       # data: (N_b, T, C, H, W)
        self._fit_seq(self._to_seq(data))

    def forward(self, data):                   # data: (N_b,T,C,H,W) -> (N_b,C,H,W)
        return self._forward_seq(self._to_seq(data), data.shape[0])

    def fit_predict(self, data):
        """fit() + forward() on the same clip with a single HBM transpose."""
        seq = self._to_seq(data)
        self._fit_seq(seq)
        return self._forward_seq(seq, data.shape[0])


class MR_ESN_VP:
    def __init__(self, arg):
        self.T_out = arg["T_out"]
        H, W = arg["H"], arg["W"]
        node_num = arg.get("node_num", 500)
        self.resolution_list = sorted(
            [int(H / 3.0), int(H / 2.5), int(H / 2.0), int(H / 1.5), H])
        self.nfpm_list = [
            NextFramePrediction(res, res, 3, node_num, seed=r + 1)
            for r, res in enumerate(self.resolution_list)
        ]
        # Image-fusion weights k of shape (C, 2) per adjacent resolution pair.
        # The reference __init__ sets k = zeros; we deterministically initialize
        # them to the values MR_ESN_VP.fit() would install (0.1/0.9, ..., 0.8/0.2).
        C = 3
        self.ifm_k = []
        for r in range(len(self.resolution_list) - 1):
            k0 = 0.8 if r >= 3 else 0.1
            k = np.zeros((C, 2), dtype=np.float32)
            k[:, 0] = k0
            k[:, 1] = 1.0 - k0
            self.ifm_k.append(jnp.asarray(k))

    def resize_dataset(self, dataset, toH, toW):
        N, T, C, H, W = dataset.shape
        if (toH, toW) == (H, W):
            return dataset
        flat = dataset.reshape(N * T * C, H, W)
        rh = jnp.asarray(_bilinear_matrix(H, toH))        # (toH, H)
        rwt = jnp.asarray(_bilinear_matrix(W, toW).T)     # (W, toW)
        out = pallas_resize_stack(flat, rh, rwt)
        return out.reshape(N, T, C, toH, toW)

    def forward(self, data_in, data_out, is_train=False):
        N_b, T_in, C, H, W = data_in.shape
        R = len(self.nfpm_list)
        r_last = R - 2                          # index of the surviving fusion pair
        res_last = self.resolution_list[-1]

        # data_out never changes across the outer loop: resize it once (identity
        # when res_last == H) instead of once per (t, r).
        data_out_last = self.resize_dataset(data_out, res_last, res_last)

        # NOTE: the reference runs an initial per-resolution fit pass here which
        # is identical to the refit performed at t=0 inside the loop below (fit
        # is a pure function of the data), so it is skipped.
        for t in range(self.T_out):
            next_frame_list = []
            for r in range(R):
                res = self.nfpm_list[r].H
                data_in_resized = self.resize_dataset(data_in, res, res)
                # One transpose feeds both the fit and the forward kernels.
                next_frame = self.nfpm_list[r].fit_predict(data_in_resized)
                next_frame_list.append(jnp.clip(next_frame, 0.0, 1.0))

            # The reference overwrites I_fused on every iteration of its
            # `for r in range(R-1)` loop, so only the LAST pair contributes to
            # the returned frames; the dead lower-resolution fusions and
            # data_out resizes are skipped (output is identical).
            img_a = next_frame_list[r_last + 1]
            data_true = data_out_last[:, t]
            if is_train:
                # TODO(synk): the train path only records design matrices for
                # ImageFusionModule.fit (training state); its forward output
                # reduces to the clamped ground truth.
                I_fused = jnp.clip(data_true, 0.0, 1.0)
            else:
                # eval path of the reference: fuse img_a with data_true (the
                # img_b resize is a no-op: both at res_last); the fusion kernel
                # also applies the subsequent clamp.
                I_fused = image_fusion(self.ifm_k[r_last], img_a, data_true)

            data_in = jnp.concatenate([data_in, I_fused[:, None]], axis=1)

        return data_in[:, T_in:]


# ----------------------------------------------------------------------------
# Demo
# ----------------------------------------------------------------------------

if __name__ == "__main__":
    key = jax.random.PRNGKey(0)
    k_in, k_out = jax.random.split(key)

    N_b, T_in, C, H, W = 2, 5, 3, 16, 16
    T_out = 1
    node_num = 32  # small reservoir for the demo (module default 500 -> padded 512)

    data_in = jax.random.uniform(k_in, (N_b, T_in, C, H, W), dtype=jnp.float32)
    data_out = jax.random.uniform(k_out, (N_b, T_out, C, H, W), dtype=jnp.float32)

    model = MR_ESN_VP({"T_out": T_out, "H": H, "W": W, "node_num": node_num})
    pred = model.forward(data_in, data_out, is_train=False)
    pred = jax.block_until_ready(pred)

    assert pred.shape == (N_b, T_out, C, H, W), pred.shape
    assert bool(jnp.all(jnp.isfinite(pred)))
    assert bool(jnp.all(pred >= 0.0)) and bool(jnp.all(pred <= 1.0))
    print("KERNEL_OK")
</pallas_src>

<mosaic_0001>
module attributes {stable_mosaic.version = 11 : i64} {
  func.func @_resize_kernel(%arg0: i32, %arg1: memref<5x16xf32, #tpu.memory_space<vmem>>, %arg2: memref<16x5xf32, #tpu.memory_space<vmem>>, %arg3: memref<30x16x16xf32, #tpu.memory_space<vmem>>, %arg4: memref<30x5x5xf32, #tpu.memory_space<vmem>>) attributes {dimension_semantics = [#tpu.dimension_semantics<parallel>], iteration_bounds = array<i64: 1>, scalar_prefetch = 0 : i64, scratch_operands = 0 : i64, tpu.core_type = #tpu.core_type<tc>, window_params = [{pipeline_mode = #tpu.pipeline_mode<synchronous>, transform_indices = @transform_0, window_bounds = array<i64: 5, 16>}, {pipeline_mode = #tpu.pipeline_mode<synchronous>, transform_indices = @transform_1, window_bounds = array<i64: 16, 5>}, {transform_indices = @transform_2, window_bounds = array<i64: 30, 16, 16>}, {transform_indices = @transform_3, window_bounds = array<i64: 30, 5, 5>}]} {
    %c0 = arith.constant 0 : index
    %c0_0 = arith.constant 0 : index
    %c0_1 = arith.constant 0 : index
    %0 = vector.load %arg3[%c0, %c0_0, %c0_1] : memref<30x16x16xf32, #tpu.memory_space<vmem>>, vector<30x16x16xf32>
    %1 = vector.shape_cast %0 : vector<30x16x16xf32> to vector<480x16xf32>
    %c0_2 = arith.constant 0 : index
    %c0_3 = arith.constant 0 : index
    %2 = vector.load %arg2[%c0_2, %c0_3] : memref<16x5xf32, #tpu.memory_space<vmem>>, vector<16x5xf32>
    %cst = arith.constant dense<0.000000e+00> : vector<480x5xf32>
    %3 = tpu.matmul %1, %2, %cst {dimension_numbers = #tpu.dot_dimension_numbers<[1], [0], [0], [1], [0, 0, 1, 1], [], []>} : vector<480x16xf32>, vector<16x5xf32>, vector<480x5xf32> -> vector<480x5xf32>
    %4 = vector.shape_cast %3 : vector<480x5xf32> to vector<30x16x5xf32>
    %c0_4 = arith.constant 0 : index
    %c0_5 = arith.constant 0 : index
    %5 = vector.load %arg1[%c0_4, %c0_5] : memref<5x16xf32, #tpu.memory_space<vmem>>, vector<5x16xf32>
    %6 = vector.shape_cast %5 : vector<5x16xf32> to vector<1x5x16xf32>
    %7 = vector.shape_cast %6 : vector<1x5x16xf32> to vector<1x5x16xf32>
    %8 = vector.broadcast %7 : vector<1x5x16xf32> to vector<30x5x16xf32>
    %cst_6 = arith.constant dense<0.000000e+00> : vector<30x5x5xf32>
    %9 = tpu.matmul %8, %4, %cst_6 {dimension_numbers = #tpu.dot_dimension_numbers<[2], [1], [1], [2], [0, 0, 0, 1, 1, 2], [0], [0]>} : vector<30x5x16xf32>, vector<30x16x5xf32>, vector<30x5x5xf32> -> vector<30x5x5xf32>
    %c0_7 = arith.constant 0 : index
    %c0_8 = arith.constant 0 : index
    %c0_9 = arith.constant 0 : index
    %10 = vector.load %arg4[%c0_7, %c0_8, %c0_9] : memref<30x5x5xf32, #tpu.memory_space<vmem>>, vector<30x5x5xf32>
    tpu.vector_store %arg4[%c0_7, %c0_8, %c0_9], %9 {strides = array<i32>} : memref<30x5x5xf32, #tpu.memory_space<vmem>>, vector<30x5x5xf32>,
    return
  }
  func.func @transform_0(%arg0: i32) -> (i32, i32) {
    %c0_i32 = arith.constant 0 : i32
    %c0_i32_0 = arith.constant 0 : i32
    %c0_i32_1 = arith.constant 0 : i32
    return %c0_i32, %c0_i32_0 : i32, i32
  }
  func.func @transform_1(%arg0: i32) -> (i32, i32) {
    %c0_i32 = arith.constant 0 : i32
    %c0_i32_0 = arith.constant 0 : i32
    %c0_i32_1 = arith.constant 0 : i32
    return %c0_i32, %c0_i32_0 : i32, i32
  }
  func.func @transform_2(%arg0: i32) -> (i32, i32, i32) {
    %c0_i32 = arith.constant 0 : i32
    %c0_i32_0 = arith.constant 0 : i32
    %c0_i32_1 = arith.constant 0 : i32
    return %arg0, %c0_i32, %c0_i32_0 : i32, i32, i32
  }
  func.func @transform_3(%arg0: i32) -> (i32, i32, i32) {
    %c0_i32 = arith.constant 0 : i32
    %c0_i32_0 = arith.constant 0 : i32
    %c0_i32_1 = arith.constant 0 : i32
    return %arg0, %c0_i32, %c0_i32_0 : i32, i32, i32
  }
}

</mosaic_0001>

<bundles_post_ra>
// kernel: tpu_custom_call.1
= control target key start
LH: loop header
LB: loop body
LE: loop exit
PB: predicated region body
PF: predicated region fallthrough
CT: control target
= control target key end

     0   :  { %vm76_vm0 = vcmask 130048   ;;  %v3309_v37 = vmov 0.0   ;;  %vm3310_vm1 = vmmov 0   ;;  %vm2726_vm2 = vcmask 36864   ;;  %s3882_s1 = inlined_call_operand.vmem [shape: f32[16,5], index: 1, kind: input, shape index: {}]   ;;  %s3883_s2 = inlined_call_operand.vmem [shape: f32[30,16,16], index: 2, kind: input, shape index: {}]   ;;  %s3884_s0 = inlined_call_operand.vmem [shape: f32[5,16], index: 0, kind: input, shape index: {}]   ;;  %s3885_s3 = inlined_call_operand.vmem [shape: f32[30,5,5], index: 3, kind: output, shape index: {}]  }
   0x1   :  { %v75_v0 = vld [vmem:[%s3882_s1 + $0x8] sm:$0xff]  ;;  %v74_v1 = vld [vmem:[%s3882_s1] sm:$0xff]  ;;  %v16_v4 = vld [vmem:[%s3883_s2 + $0x10] sm:$0xff]  ;;  %3097 = vmatprep.subr.mxu1 %v3309_v37  ;;  %3101 = vmatprep.mubr.msk.f32.mxu1 %vm3310_vm1, %v3309_v37 }
   0x2   :  { %v14_v2 = vld [vmem:[%s3883_s2] sm:$0xff]  ;;  %3003 = vmatprep.subr.mxu0 %v75_v0  ;;  %v15_v3 = vld [vmem:[%s3883_s2 + $0x8] sm:$0xff]  ;;  %v17_v5 = vld [vmem:[%s3883_s2 + $0x18] sm:$0xff] }
   0x3   :  { %3007 = vmatprep.mubr.msk.f32.mxu0 %vm76_vm0, %v14_v2  ;;  %3004 = vmatpush3.msra.mxu0 %v75_v0  ;;  %v18_v6 = vld [vmem:[%s3883_s2 + $0x20] sm:$0xff]  ;;  %v19_v7 = vld [vmem:[%s3883_s2 + $0x28] sm:$0xff]  ;;  %v20_v8 = vld [vmem:[%s3883_s2 + $0x30] sm:$0xff] }
   0x4   :  { %3005 = vmatprep.subr.mxu0 %v74_v1  ;;  %v21_v9 = vld [vmem:[%s3883_s2 + $0x38] sm:$0xff]  ;;  %v22_v10 = vld [vmem:[%s3883_s2 + $0x40] sm:$0xff]  ;;  %v23_v11 = vld [vmem:[%s3883_s2 + $0x48] sm:$0xff] }
   0x5   :  { %3006 = vmatpush3.msra.mxu0 %v74_v1  ;;  %v24_v12 = vld [vmem:[%s3883_s2 + $0x50] sm:$0xff]  ;;  %v25_v13 = vld [vmem:[%s3883_s2 + $0x58] sm:$0xff]  ;;  %v26_v14 = vld [vmem:[%s3883_s2 + $0x60] sm:$0xff] }
   0x6   :  { %3008 = vmatmul.mubr.msk.f32.vlgmr.msra.gmra.mxu0 %vm76_vm0, %v15_v3  ;;  %v27_v15 = vld [vmem:[%s3883_s2 + $0x68] sm:$0xff]  ;;  %v28_v16 = vld [vmem:[%s3883_s2 + $0x70] sm:$0xff]  ;;  %v29_v17 = vld [vmem:[%s3883_s2 + $0x78] sm:$0xff] }
   0x7   :  { %3010 = vmatprep.mubr.msk.f32.mxu0 %vm76_vm0, %v16_v4  ;;  %v30_v18 = vld [vmem:[%s3883_s2 + $0x80] sm:$0xff]  ;;  %v31_v19 = vld [vmem:[%s3883_s2 + $0x88] sm:$0xff]  ;;  %v32_v20 = vld [vmem:[%s3883_s2 + $0x90] sm:$0xff] }
   0x8   :  { %v33_v21 = vld [vmem:[%s3883_s2 + $0x98] sm:$0xff]  ;;  %v34_v22 = vld [vmem:[%s3883_s2 + $0xa0] sm:$0xff]  ;;  %v35_v23 = vld [vmem:[%s3883_s2 + $0xa8] sm:$0xff] }
   0x9   :  { %v36_v24 = vld [vmem:[%s3883_s2 + $0xb0] sm:$0xff]  ;;  %v37_v25 = vld [vmem:[%s3883_s2 + $0xb8] sm:$0xff]  ;;  %v38_v26 = vld [vmem:[%s3883_s2 + $0xc0] sm:$0xff] }
   0xa   :  { %3011 = vmatmul.mubr.msk.f32.gmra.mxu0 %vm76_vm0, %v17_v5  ;;  %v39_v27 = vld [vmem:[%s3883_s2 + $0xc8] sm:$0xff]  ;;  %v40_v28 = vld [vmem:[%s3883_s2 + $0xd0] sm:$0xff]  ;;  %v41_v29 = vld [vmem:[%s3883_s2 + $0xd8] sm:$0xff] }
   0xb   :  { %3013 = vmatprep.mubr.msk.f32.mxu0 %vm76_vm0, %v18_v6  ;;  %v42_v30 = vld [vmem:[%s3883_s2 + $0xe0] sm:$0xff]  ;;  %v43_v31 = vld [vmem:[%s3883_s2 + $0xe8] sm:$0xff]  ;;  %v44_v32 = vld [vmem:[%s3883_s2 + $0xf0] sm:$0xff] }
   0xc   :  { %v45_v33 = vld [vmem:[%s3883_s2 + $0xf8] sm:$0xff]  ;;  %v46_v34 = vld [vmem:[%s3883_s2 + $0x100] sm:$0xff]  ;;  %v47_v35 = vld [vmem:[%s3883_s2 + $0x108] sm:$0xff] }
   0xd   :  { %v48_v36 = vld [vmem:[%s3883_s2 + $0x110] sm:$0xff]  ;;  %v49_v38 = vld [vmem:[%s3883_s2 + $0x118] sm:$0xff]  ;;  %v50_v39 = vld [vmem:[%s3883_s2 + $0x120] sm:$0xff] }
   0xe   :  { %3014 = vmatmul.mubr.msk.f32.gmra.mxu0 %vm76_vm0, %v19_v7  ;;  %v51_v40 = vld [vmem:[%s3883_s2 + $0x128] sm:$0xff]  ;;  %v52_v41 = vld [vmem:[%s3883_s2 + $0x130] sm:$0xff]  ;;  %v53_v42 = vld [vmem:[%s3883_s2 + $0x138] sm:$0xff] }
   0xf   :  { %3016 = vmatprep.mubr.msk.f32.mxu0 %vm76_vm0, %v20_v8  ;;  %v54_v43 = vld [vmem:[%s3883_s2 + $0x140] sm:$0xff]  ;;  %v55_v44 = vld [vmem:[%s3883_s2 + $0x148] sm:$0xff]  ;;  %v56_v45 = vld [vmem:[%s3883_s2 + $0x150] sm:$0xff] }
  0x10   :  { %v57_v46 = vld [vmem:[%s3883_s2 + $0x158] sm:$0xff]  ;;  %v58_v47 = vld [vmem:[%s3883_s2 + $0x160] sm:$0xff]  ;;  %v59_v48 = vld [vmem:[%s3883_s2 + $0x168] sm:$0xff] }
  0x11   :  { %v60_v49 = vld [vmem:[%s3883_s2 + $0x170] sm:$0xff]  ;;  %v61_v50 = vld [vmem:[%s3883_s2 + $0x178] sm:$0xff]  ;;  %v62_v51 = vld [vmem:[%s3883_s2 + $0x180] sm:$0xff] }
  0x12   :  { %3017 = vmatmul.mubr.msk.f32.gmra.mxu0 %vm76_vm0, %v21_v9  ;;  %v63_v52 = vld [vmem:[%s3883_s2 + $0x188] sm:$0xff]  ;;  %v64_v53 = vld [vmem:[%s3883_s2 + $0x190] sm:$0xff]  ;;  %v65_v54 = vld [vmem:[%s3883_s2 + $0x198] sm:$0xff] }
  0x13   :  { %3019 = vmatprep.mubr.msk.f32.mxu0 %vm76_vm0, %v22_v10  ;;  %v66_v55 = vld [vmem:[%s3883_s2 + $0x1a0] sm:$0xff]  ;;  %v67_v56 = vld [vmem:[%s3883_s2 + $0x1a8] sm:$0xff]  ;;  %v68_v57 = vld [vmem:[%s3883_s2 + $0x1b0] sm:$0xff] }
  0x14   :  { %v69_v58 = vld [vmem:[%s3883_s2 + $0x1b8] sm:$0xff]  ;;  %v70_v59 = vld [vmem:[%s3883_s2 + $0x1c0] sm:$0xff]  ;;  %v71_v60 = vld [vmem:[%s3883_s2 + $0x1c8] sm:$0xff] }
  0x15   :  { %v72_v61 = vld [vmem:[%s3883_s2 + $0x1d0] sm:$0xff]  ;;  %v73_v62 = vld [vmem:[%s3883_s2 + $0x1d8] sm:$0xff]  ;;  %v3583_v0 = vld [vmem:[%s3884_s0] sm:$0x1f] }
  0x16   :  { %3020 = vmatmul.mubr.msk.f32.gmra.mxu0 %vm76_vm0, %v23_v11 }
  0x17   :  { %3022 = vmatprep.mubr.msk.f32.mxu0 %vm76_vm0, %v24_v12 }
  0x1a   :  { %3023 = vmatmul.mubr.msk.f32.gmra.mxu0 %vm76_vm0, %v25_v13 }
  0x1b   :  { %3025 = vmatprep.mubr.msk.f32.mxu0 %vm76_vm0, %v26_v14 }
  0x1e   :  { %3026 = vmatmul.mubr.msk.f32.gmra.mxu0 %vm76_vm0, %v27_v15 }
  0x1f   :  { %3028 = vmatprep.mubr.msk.f32.mxu0 %vm76_vm0, %v28_v16 }
  0x22   :  { %3029 = vmatmul.mubr.msk.f32.gmra.mxu0 %vm76_vm0, %v29_v17 }
  0x23   :  { %3031 = vmatprep.mubr.msk.f32.mxu0 %vm76_vm0, %v30_v18 }
  0x26   :  { %3032 = vmatmul.mubr.msk.f32.gmra.mxu0 %vm76_vm0, %v31_v19 }
  0x27   :  { %3034 = vmatprep.mubr.msk.f32.mxu0 %vm76_vm0, %v32_v20 }
  0x2a   :  { %3035 = vmatmul.mubr.msk.f32.gmra.mxu0 %vm76_vm0, %v33_v21 }
  0x2b   :  { %3037 = vmatprep.mubr.msk.f32.mxu0 %vm76_vm0, %v34_v22 }
  0x2e   :  { %3038 = vmatmul.mubr.msk.f32.gmra.mxu0 %vm76_vm0, %v35_v23 }
  0x2f   :  { %3040 = vmatprep.mubr.msk.f32.mxu0 %vm76_vm0, %v36_v24 }
  0x32   :  { %3041 = vmatmul.mubr.msk.f32.gmra.mxu0 %vm76_vm0, %v37_v25 }
  0x33   :  { %3043 = vmatprep.mubr.msk.f32.mxu0 %vm76_vm0, %v38_v26 }
  0x36   :  { %3044 = vmatmul.mubr.msk.f32.gmra.mxu0 %vm76_vm0, %v39_v27 }
  0x37   :  { %3046 = vmatprep.mubr.msk.f32.mxu0 %vm76_vm0, %v40_v28 }
  0x3a   :  { %3047 = vmatmul.mubr.msk.f32.gmra.mxu0 %vm76_vm0, %v41_v29 }
  0x3b   :  { %3049 = vmatprep.mubr.msk.f32.mxu0 %vm76_vm0, %v42_v30 }
  0x3e   :  { %3050 = vmatmul.mubr.msk.f32.gmra.mxu0 %vm76_vm0, %v43_v31 }
  0x3f   :  { %3052 = vmatprep.mubr.msk.f32.mxu0 %vm76_vm0, %v44_v32 }
  0x42   :  { %3053 = vmatmul.mubr.msk.f32.gmra.mxu0 %vm76_vm0, %v45_v33 }
  0x43   :  { %3055 = vmatprep.mubr.msk.f32.mxu0 %vm76_vm0, %v46_v34 }
  0x46   :  { %3056 = vmatmul.mubr.msk.f32.gmra.mxu0 %vm76_vm0, %v47_v35 }
  0x47   :  { %3058 = vmatprep.mubr.msk.f32.mxu0 %vm76_vm0, %v48_v36 }
  0x4a   :  { %3059 = vmatmul.mubr.msk.f32.gmra.mxu0 %vm76_vm0, %v49_v38 }
  0x4b   :  { %3061 = vmatprep.mubr.msk.f32.mxu0 %vm76_vm0, %v50_v39 }
  0x4e   :  { %3062 = vmatmul.mubr.msk.f32.gmra.mxu0 %vm76_vm0, %v51_v40 }
  0x4f   :  { %3064 = vmatprep.mubr.msk.f32.mxu0 %vm76_vm0, %v52_v41 }
  0x52   :  { %3065 = vmatmul.mubr.msk.f32.gmra.mxu0 %vm76_vm0, %v53_v42 }
  0x53   :  { %3067 = vmatprep.mubr.msk.f32.mxu0 %vm76_vm0, %v54_v43 }
  0x56   :  { %3068 = vmatmul.mubr.msk.f32.gmra.mxu0 %vm76_vm0, %v55_v44 }
  0x57   :  { %3070 = vmatprep.mubr.msk.f32.mxu0 %vm76_vm0, %v56_v45 }
  0x5a   :  { %3071 = vmatmul.mubr.msk.f32.gmra.mxu0 %vm76_vm0, %v57_v46 }
  0x5b   :  { %3073 = vmatprep.mubr.msk.f32.mxu0 %vm76_vm0, %v58_v47 }
  0x5e   :  { %3074 = vmatmul.mubr.msk.f32.gmra.mxu0 %vm76_vm0, %v59_v48 }
  0x5f   :  { %3076 = vmatprep.mubr.msk.f32.mxu0 %vm76_vm0, %v60_v49 }
  0x62   :  { %3077 = vmatmul.mubr.msk.f32.gmra.mxu0 %vm76_vm0, %v61_v50 }
  0x63   :  { %3079 = vmatprep.mubr.msk.f32.mxu0 %vm76_vm0, %v62_v51 }
  0x66   :  { %3080 = vmatmul.mubr.msk.f32.gmra.mxu0 %vm76_vm0, %v63_v52 }
  0x67   :  { %3082 = vmatprep.mubr.msk.f32.mxu0 %vm76_vm0, %v64_v53 }
  0x6a   :  { %3083 = vmatmul.mubr.msk.f32.gmra.mxu0 %vm76_vm0, %v65_v54 }
  0x6b   :  { %3085 = vmatprep.mubr.msk.f32.mxu0 %vm76_vm0, %v66_v55 }
  0x6e   :  { %3086 = vmatmul.mubr.msk.f32.gmra.mxu0 %vm76_vm0, %v67_v56 }
  0x6f   :  { %3088 = vmatprep.mubr.msk.f32.mxu0 %vm76_vm0, %v68_v57 }
  0x72   :  { %3089 = vmatmul.mubr.msk.f32.gmra.mxu0 %vm76_vm0, %v69_v58 }
  0x73   :  { %3091 = vmatprep.mubr.msk.f32.mxu0 %vm76_vm0, %v70_v59 }
  0x76   :  { %3092 = vmatmul.mubr.msk.f32.gmra.mxu0 %vm76_vm0, %v71_v60 }
  0x77   :  { %3094 = vmatprep.mubr.msk.f32.mxu0 %vm76_vm0, %v72_v61 }
  0x7a   :  { %3095 = vmatmul.mubr.msk.f32.gmra.mxu0 %vm76_vm0, %v73_v62 }
  0xc6   :  { %v3009_v63 = vpop.f32.mrf.mxu0 }
  0xc7   :  { %3098 = vmatpush3.msra.mxu1 %v3009_v63 }
  0xc8   :  { %v323_v1 = vpop.f32.mrf.mxu0  ;;  %3099 = vmatprep.subr.mxu1 %v3309_v37 }
  0xc9   :  { %3100 = vmatpush3.msra.mxu1 %v323_v1 }
  0xca   :  { %v3012_v2 = vpop.f32.mrf.mxu0  ;;  %3102 = vmatmul.mubr.msk.f32.vlgmr.msra.gmra.mxu1 %vm76_vm0, %v3583_v0  ;;  %3104 = vmatprep.subr.mxu1 %v3309_v37 }
  0xcb   :  { %3105 = vmatpush3.msra.mxu1 %v3012_v2  ;;  %3108 = vmatprep.mubr.msk.f32.mxu1 %vm3310_vm1, %v3309_v37 }
  0xcc   :  { %v333_v3 = vpop.f32.mrf.mxu0  ;;  %3106 = vmatprep.subr.mxu1 %v3309_v37 }
  0xcd   :  { %3107 = vmatpush3.msra.mxu1 %v333_v3 }
  0xce   :  { %v3015_v4 = vpop.f32.mrf.mxu0  ;;  %3109 = vmatmul.mubr.msk.f32.vlgmr.msra.gmra.mxu1 %vm76_vm0, %v3583_v0  ;;  %3111 = vmatprep.subr.mxu1 %v3309_v37 }
  0xcf   :  { %3112 = vmatpush3.msra.mxu1 %v3015_v4  ;;  %3115 = vmatprep.mubr.msk.f32.mxu1 %vm3310_vm1, %v3309_v37 }
  0xd0   :  { %v343_v5 = vpop.f32.mrf.mxu0  ;;  %3113 = vmatprep.subr.mxu1 %v3309_v37 }
  0xd1   :  { %3114 = vmatpush3.msra.mxu1 %v343_v5 }
  0xd2   :  { %v3018_v6 = vpop.f32.mrf.mxu0  ;;  %3116 = vmatmul.mubr.msk.f32.vlgmr.msra.gmra.mxu1 %vm76_vm0, %v3583_v0  ;;  %3118 = vmatprep.subr.mxu1 %v3309_v37 }
  0xd3   :  { %3119 = vmatpush3.msra.mxu1 %v3018_v6  ;;  %3122 = vmatprep.mubr.msk.f32.mxu1 %vm3310_vm1, %v3309_v37 }
  0xd4   :  { %v353_v7 = vpop.f32.mrf.mxu0  ;;  %3120 = vmatprep.subr.mxu1 %v3309_v37 }
  0xd5   :  { %3121 = vmatpush3.msra.mxu1 %v353_v7 }
  0xd6   :  { %v3021_v8 = vpop.f32.mrf.mxu0  ;;  %3123 = vmatmul.mubr.msk.f32.vlgmr.msra.gmra.mxu1 %vm76_vm0, %v3583_v0  ;;  %3125 = vmatprep.subr.mxu1 %v3309_v37 }
  0xd7   :  { %3126 = vmatpush3.msra.mxu1 %v3021_v8  ;;  %3129 = vmatprep.mubr.msk.f32.mxu1 %vm3310_vm1, %v3309_v37 }
  0xd8   :  { %v363_v9 = vpop.f32.mrf.mxu0  ;;  %3127 = vmatprep.subr.mxu1 %v3309_v37 }
  0xd9   :  { %3128 = vmatpush3.msra.mxu1 %v363_v9 }
  0xda   :  { %v3024_v10 = vpop.f32.mrf.mxu0  ;;  %3130 = vmatmul.mubr.msk.f32.vlgmr.msra.gmra.mxu1 %vm76_vm0, %v3583_v0  ;;  %3132 = vmatprep.subr.mxu1 %v3309_v37 }
  0xdb   :  { %3133 = vmatpush3.msra.mxu1 %v3024_v10  ;;  %3136 = vmatprep.mubr.msk.f32.mxu1 %vm3310_vm1, %v3309_v37 }
  0xdc   :  { %v373_v11 = vpop.f32.mrf.mxu0  ;;  %3134 = vmatprep.subr.mxu1 %v3309_v37 }
  0xdd   :  { %3135 = vmatpush3.msra.mxu1 %v373_v11 }
  0xde   :  { %v3027_v12 = vpop.f32.mrf.mxu0  ;;  %3137 = vmatmul.mubr.msk.f32.vlgmr.msra.gmra.mxu1 %vm76_vm0, %v3583_v0  ;;  %3139 = vmatprep.subr.mxu1 %v3309_v37 }
  0xdf   :  { %3140 = vmatpush3.msra.mxu1 %v3027_v12  ;;  %3143 = vmatprep.mubr.msk.f32.mxu1 %vm3310_vm1, %v3309_v37 }
  0xe0   :  { %v383_v13 = vpop.f32.mrf.mxu0  ;;  %3141 = vmatprep.subr.mxu1 %v3309_v37 }
  0xe1   :  { %3142 = vmatpush3.msra.mxu1 %v383_v13 }
  0xe2   :  { %v3030_v14 = vpop.f32.mrf.mxu0  ;;  %3144 = vmatmul.mubr.msk.f32.vlgmr.msra.gmra.mxu1 %vm76_vm0, %v3583_v0  ;;  %3146 = vmatprep.subr.mxu1 %v3309_v37 }
  0xe3   :  { %3147 = vmatpush3.msra.mxu1 %v3030_v14  ;;  %3150 = vmatprep.mubr.msk.f32.mxu1 %vm3310_vm1, %v3309_v37 }
  0xe4   :  { %v393_v15 = vpop.f32.mrf.mxu0  ;;  %3148 = vmatprep.subr.mxu1 %v3309_v37 }
  0xe5   :  { %3149 = vmatpush3.msra.mxu1 %v393_v15 }
  0xe6   :  { %v3033_v16 = vpop.f32.mrf.mxu0  ;;  %3151 = vmatmul.mubr.msk.f32.vlgmr.msra.gmra.mxu1 %vm76_vm0, %v3583_v0  ;;  %3153 = vmatprep.subr.mxu1 %v3309_v37 }
  0xe7   :  { %3154 = vmatpush3.msra.mxu1 %v3033_v16  ;;  %3157 = vmatprep.mubr.msk.f32.mxu1 %vm3310_vm1, %v3309_v37 }
  0xe8   :  { %v403_v17 = vpop.f32.mrf.mxu0  ;;  %3155 = vmatprep.subr.mxu1 %v3309_v37 }
  0xe9   :  { %3156 = vmatpush3.msra.mxu1 %v403_v17 }
  0xea   :  { %v3036_v18 = vpop.f32.mrf.mxu0  ;;  %3158 = vmatmul.mubr.msk.f32.vlgmr.msra.gmra.mxu1 %vm76_vm0, %v3583_v0  ;;  %3160 = vmatprep.subr.mxu1 %v3309_v37 }
  0xeb   :  { %3161 = vmatpush3.msra.mxu1 %v3036_v18  ;;  %3164 = vmatprep.mubr.msk.f32.mxu1 %vm3310_vm1, %v3309_v37 }
  0xec   :  { %v413_v19 = vpop.f32.mrf.mxu0  ;;  %3162 = vmatprep.subr.mxu1 %v3309_v37 }
  0xed   :  { %3163 = vmatpush3.msra.mxu1 %v413_v19 }
  0xee   :  { %v3039_v20 = vpop.f32.mrf.mxu0  ;;  %3165 = vmatmul.mubr.msk.f32.vlgmr.msra.gmra.mxu1 %vm76_vm0, %v3583_v0  ;;  %3167 = vmatprep.subr.mxu1 %v3309_v37 }
  0xef   :  { %3168 = vmatpush3.msra.mxu1 %v3039_v20  ;;  %3171 = vmatprep.mubr.msk.f32.mxu1 %vm3310_vm1, %v3309_v37 }
  0xf0   :  { %v423_v21 = vpop.f32.mrf.mxu0  ;;  %3169 = vmatprep.subr.mxu1 %v3309_v37 }
  0xf1   :  { %3170 = vmatpush3.msra.mxu1 %v423_v21 }
  0xf2   :  { %v3042_v22 = vpop.f32.mrf.mxu0  ;;  %3172 = vmatmul.mubr.msk.f32.vlgmr.msra.gmra.mxu1 %vm76_vm0, %v3583_v0  ;;  %3174 = vmatprep.subr.mxu1 %v3309_v37 }
  0xf3   :  { %3175 = vmatpush3.msra.mxu1 %v3042_v22  ;;  %3178 = vmatprep.mubr.msk.f32.mxu1 %vm3310_vm1, %v3309_v37 }
  0xf4   :  { %v433_v23 = vpop.f32.mrf.mxu0  ;;  %3176 = vmatprep.subr.mxu1 %v3309_v37 }
  0xf5   :  { %3177 = vmatpush3.msra.mxu1 %v433_v23 }
  0xf6   :  { %v3045_v24 = vpop.f32.mrf.mxu0  ;;  %3179 = vmatmul.mubr.msk.f32.vlgmr.msra.gmra.mxu1 %vm76_vm0, %v3583_v0  ;;  %3181 = vmatprep.subr.mxu1 %v3309_v37 }
  0xf7   :  { %3182 = vmatpush3.msra.mxu1 %v3045_v24  ;;  %3185 = vmatprep.mubr.msk.f32.mxu1 %vm3310_vm1, %v3309_v37 }
  0xf8   :  { %v443_v25 = vpop.f32.mrf.mxu0  ;;  %3183 = vmatprep.subr.mxu1 %v3309_v37 }
  0xf9   :  { %3184 = vmatpush3.msra.mxu1 %v443_v25 }
  0xfa   :  { %v3048_v26 = vpop.f32.mrf.mxu0  ;;  %3186 = vmatmul.mubr.msk.f32.vlgmr.msra.gmra.mxu1 %vm76_vm0, %v3583_v0  ;;  %3188 = vmatprep.subr.mxu1 %v3309_v37 }
  0xfb   :  { %3189 = vmatpush3.msra.mxu1 %v3048_v26  ;;  %3192 = vmatprep.mubr.msk.f32.mxu1 %vm3310_vm1, %v3309_v37 }
  0xfc   :  { %v453_v27 = vpop.f32.mrf.mxu0  ;;  %3190 = vmatprep.subr.mxu1 %v3309_v37 }
  0xfd   :  { %3191 = vmatpush3.msra.mxu1 %v453_v27 }
  0xfe   :  { %v3051_v28 = vpop.f32.mrf.mxu0  ;;  %3193 = vmatmul.mubr.msk.f32.vlgmr.msra.gmra.mxu1 %vm76_vm0, %v3583_v0  ;;  %3195 = vmatprep.subr.mxu1 %v3309_v37 }
  0xff   :  { %3196 = vmatpush3.msra.mxu1 %v3051_v28  ;;  %3199 = vmatprep.mubr.msk.f32.mxu1 %vm3310_vm1, %v3309_v37 }
 0x100   :  { %v463_v29 = vpop.f32.mrf.mxu0  ;;  %3197 = vmatprep.subr.mxu1 %v3309_v37 }
 0x101   :  { %3198 = vmatpush3.msra.mxu1 %v463_v29 }
 0x102   :  { %v3054_v30 = vpop.f32.mrf.mxu0  ;;  %3200 = vmatmul.mubr.msk.f32.vlgmr.msra.gmra.mxu1 %vm76_vm0, %v3583_v0  ;;  %3202 = vmatprep.subr.mxu1 %v3309_v37 }
 0x103   :  { %3203 = vmatpush3.msra.mxu1 %v3054_v30  ;;  %3206 = vmatprep.mubr.msk.f32.mxu1 %vm3310_vm1, %v3309_v37 }
 0x104   :  { %v473_v31 = vpop.f32.mrf.mxu0  ;;  %3204 = vmatprep.subr.mxu1 %v3309_v37 }
 0x105   :  { %3205 = vmatpush3.msra.mxu1 %v473_v31 }
 0x106   :  { %v3057_v32 = vpop.f32.mrf.mxu0  ;;  %3207 = vmatmul.mubr.msk.f32.vlgmr.msra.gmra.mxu1 %vm76_vm0, %v3583_v0  ;;  %3209 = vmatprep.subr.mxu1 %v3309_v37 }
 0x107   :  { %3210 = vmatpush3.msra.mxu1 %v3057_v32  ;;  %3213 = vmatprep.mubr.msk.f32.mxu1 %vm3310_vm1, %v3309_v37 }
 0x108   :  { %v483_v33 = vpop.f32.mrf.mxu0  ;;  %3211 = vmatprep.subr.mxu1 %v3309_v37 }
 0x109   :  { %3212 = vmatpush3.msra.mxu1 %v483_v33 }
 0x10a   :  { %v3060_v34 = vpop.f32.mrf.mxu0  ;;  %3214 = vmatmul.mubr.msk.f32.vlgmr.msra.gmra.mxu1 %vm76_vm0, %v3583_v0  ;;  %3216 = vmatprep.subr.mxu1 %v3309_v37 }
 0x10b   :  { %3217 = vmatpush3.msra.mxu1 %v3060_v34  ;;  %3220 = vmatprep.mubr.msk.f32.mxu1 %vm3310_vm1, %v3309_v37 }
 0x10c   :  { %v493_v35 = vpop.f32.mrf.mxu0  ;;  %3218 = vmatprep.subr.mxu1 %v3309_v37 }
 0x10d   :  { %3219 = vmatpush3.msra.mxu1 %v493_v35 }
 0x10e   :  { %v3063_v36 = vpop.f32.mrf.mxu0  ;;  %3221 = vmatmul.mubr.msk.f32.vlgmr.msra.gmra.mxu1 %vm76_vm0, %v3583_v0  ;;  %3223 = vmatprep.subr.mxu1 %v3309_v37 }
 0x10f   :  { %3224 = vmatpush3.msra.mxu1 %v3063_v36  ;;  %3227 = vmatprep.mubr.msk.f32.mxu1 %vm3310_vm1, %v3309_v37 }
 0x110   :  { %v503_v38 = vpop.f32.mrf.mxu0  ;;  %3225 = vmatprep.subr.mxu1 %v3309_v37 }
 0x111   :  { %3226 = vmatpush3.msra.mxu1 %v503_v38 }
 0x112   :  { %v3066_v39 = vpop.f32.mrf.mxu0  ;;  %3228 = vmatmul.mubr.msk.f32.vlgmr.msra.gmra.mxu1 %vm76_vm0, %v3583_v0  ;;  %3230 = vmatprep.subr.mxu1 %v3309_v37 }
 0x113   :  { %3231 = vmatpush3.msra.mxu1 %v3066_v39  ;;  %3234 = vmatprep.mubr.msk.f32.mxu1 %vm3310_vm1, %v3309_v37 }
 0x114   :  { %v513_v40 = vpop.f32.mrf.mxu0  ;;  %3232 = vmatprep.subr.mxu1 %v3309_v37 }
 0x115   :  { %3233 = vmatpush3.msra.mxu1 %v513_v40 }
 0x116   :  { %v3069_v41 = vpop.f32.mrf.mxu0  ;;  %3235 = vmatmul.mubr.msk.f32.vlgmr.msra.gmra.mxu1 %vm76_vm0, %v3583_v0  ;;  %3237 = vmatprep.subr.mxu1 %v3309_v37 }
 0x117   :  { %3238 = vmatpush3.msra.mxu1 %v3069_v41  ;;  %3241 = vmatprep.mubr.msk.f32.mxu1 %vm3310_vm1, %v3309_v37 }
 0x118   :  { %v523_v42 = vpop.f32.mrf.mxu0  ;;  %3239 = vmatprep.subr.mxu1 %v3309_v37 }
 0x119   :  { %3240 = vmatpush3.msra.mxu1 %v523_v42 }
 0x11a   :  { %v3072_v43 = vpop.f32.mrf.mxu0  ;;  %3242 = vmatmul.mubr.msk.f32.vlgmr.msra.gmra.mxu1 %vm76_vm0, %v3583_v0  ;;  %3244 = vmatprep.subr.mxu1 %v3309_v37 }
 0x11b   :  { %3245 = vmatpush3.msra.mxu1 %v3072_v43  ;;  %3248 = vmatprep.mubr.msk.f32.mxu1 %vm3310_vm1, %v3309_v37 }
 0x11c   :  { %v533_v44 = vpop.f32.mrf.mxu0  ;;  %3246 = vmatprep.subr.mxu1 %v3309_v37 }
 0x11d   :  { %3247 = vmatpush3.msra.mxu1 %v533_v44 }
 0x11e   :  { %v3075_v45 = vpop.f32.mrf.mxu0  ;;  %3249 = vmatmul.mubr.msk.f32.vlgmr.msra.gmra.mxu1 %vm76_vm0, %v3583_v0  ;;  %3251 = vmatprep.subr.mxu1 %v3309_v37 }
 0x11f   :  { %3252 = vmatpush3.msra.mxu1 %v3075_v45  ;;  %3255 = vmatprep.mubr.msk.f32.mxu1 %vm3310_vm1, %v3309_v37 }
 0x120   :  { %v543_v46 = vpop.f32.mrf.mxu0  ;;  %3253 = vmatprep.subr.mxu1 %v3309_v37 }
 0x121   :  { %3254 = vmatpush3.msra.mxu1 %v543_v46 }
 0x122   :  { %v3078_v47 = vpop.f32.mrf.mxu0  ;;  %3256 = vmatmul.mubr.msk.f32.vlgmr.msra.gmra.mxu1 %vm76_vm0, %v3583_v0  ;;  %3258 = vmatprep.subr.mxu1 %v3309_v37 }
 0x123   :  { %3259 = vmatpush3.msra.mxu1 %v3078_v47  ;;  %3262 = vmatprep.mubr.msk.f32.mxu1 %vm3310_vm1, %v3309_v37 }
 0x124   :  { %v553_v48 = vpop.f32.mrf.mxu0  ;;  %3260 = vmatprep.subr.mxu1 %v3309_v37 }
 0x125   :  { %3261 = vmatpush3.msra.mxu1 %v553_v48 }
 0x126   :  { %v3081_v49 = vpop.f32.mrf.mxu0  ;;  %3263 = vmatmul.mubr.msk.f32.vlgmr.msra.gmra.mxu1 %vm76_vm0, %v3583_v0  ;;  %3265 = vmatprep.subr.mxu1 %v3309_v37 }
 0x127   :  { %3266 = vmatpush3.msra.mxu1 %v3081_v49  ;;  %3269 = vmatprep.mubr.msk.f32.mxu1 %vm3310_vm1, %v3309_v37 }
 0x128   :  { %v563_v50 = vpop.f32.mrf.mxu0  ;;  %3267 = vmatprep.subr.mxu1 %v3309_v37 }
 0x129   :  { %3268 = vmatpush3.msra.mxu1 %v563_v50 }
 0x12a   :  { %v3084_v51 = vpop.f32.mrf.mxu0  ;;  %3270 = vmatmul.mubr.msk.f32.vlgmr.msra.gmra.mxu1 %vm76_vm0, %v3583_v0  ;;  %3272 = vmatprep.subr.mxu1 %v3309_v37 }
 0x12b   :  { %3273 = vmatpush3.msra.mxu1 %v3084_v51  ;;  %3276 = vmatprep.mubr.msk.f32.mxu1 %vm3310_vm1, %v3309_v37 }
 0x12c   :  { %v573_v52 = vpop.f32.mrf.mxu0  ;;  %3274 = vmatprep.subr.mxu1 %v3309_v37 }
 0x12d   :  { %3275 = vmatpush3.msra.mxu1 %v573_v52 }
 0x12e   :  { %v3087_v53 = vpop.f32.mrf.mxu0  ;;  %3277 = vmatmul.mubr.msk.f32.vlgmr.msra.gmra.mxu1 %vm76_vm0, %v3583_v0  ;;  %3279 = vmatprep.subr.mxu1 %v3309_v37 }
 0x12f   :  { %3280 = vmatpush3.msra.mxu1 %v3087_v53  ;;  %3283 = vmatprep.mubr.msk.f32.mxu1 %vm3310_vm1, %v3309_v37 }
 0x130   :  { %v583_v54 = vpop.f32.mrf.mxu0  ;;  %3281 = vmatprep.subr.mxu1 %v3309_v37 }
 0x131   :  { %3282 = vmatpush3.msra.mxu1 %v583_v54 }
 0x132   :  { %v3090_v55 = vpop.f32.mrf.mxu0  ;;  %3284 = vmatmul.mubr.msk.f32.vlgmr.msra.gmra.mxu1 %vm76_vm0, %v3583_v0  ;;  %3286 = vmatprep.subr.mxu1 %v3309_v37 }
 0x133   :  { %3287 = vmatpush3.msra.mxu1 %v3090_v55  ;;  %3290 = vmatprep.mubr.msk.f32.mxu1 %vm3310_vm1, %v3309_v37 }
 0x134   :  { %v593_v56 = vpop.f32.mrf.mxu0  ;;  %3288 = vmatprep.subr.mxu1 %v3309_v37 }
 0x135   :  { %3289 = vmatpush3.msra.mxu1 %v593_v56 }
 0x136   :  { %v3093_v57 = vpop.f32.mrf.mxu0  ;;  %3291 = vmatmul.mubr.msk.f32.vlgmr.msra.gmra.mxu1 %vm76_vm0, %v3583_v0  ;;  %3293 = vmatprep.subr.mxu1 %v3309_v37 }
 0x137   :  { %3294 = vmatpush3.msra.mxu1 %v3093_v57  ;;  %3297 = vmatprep.mubr.msk.f32.mxu1 %vm3310_vm1, %v3309_v37 }
 0x138   :  { %v603_v58 = vpop.f32.mrf.mxu0  ;;  %3295 = vmatprep.subr.mxu1 %v3309_v37 }
 0x139   :  { %3296 = vmatpush3.msra.mxu1 %v603_v58 }
 0x13a   :  { %v3096_v59 = vpop.f32.mrf.mxu0  ;;  %3298 = vmatmul.mubr.msk.f32.vlgmr.msra.gmra.mxu1 %vm76_vm0, %v3583_v0  ;;  %3300 = vmatprep.subr.mxu1 %v3309_v37 }
 0x13b   :  { %3301 = vmatpush3.msra.mxu1 %v3096_v59  ;;  %3304 = vmatprep.mubr.msk.f32.mxu1 %vm3310_vm1, %v3309_v37 }
 0x13c   :  { %v613_v60 = vpop.f32.mrf.mxu0  ;;  %3302 = vmatprep.subr.mxu1 %v3309_v37 }
 0x13d   :  { %3303 = vmatpush3.msra.mxu1 %v613_v60 }
 0x13e   :  { %3305 = vmatmul.mubr.msk.f32.vlgmr.msra.gmra.mxu1 %vm76_vm0, %v3583_v0 }
 0x18a   :  { %v692_v61 = vpop.f32.mrf.mxu1 }
 0x18b   :  { %2727 = vst.msk [vmem:[%s3885_s3] sm:$0x1f] %vm2726_vm2, %v692_v61 }
 0x18c   :  { %v3103_v62 = vpop.f32.mrf.mxu1 }
 0x18e   :  { %v762_v63 = vpop.f32.mrf.mxu1 }
 0x18f   :  { %2728 = vst.msk [vmem:[%s3885_s3 + $0x8] sm:$0x1f] %vm2726_vm2, %v762_v63 }
 0x190   :  { %v3110_v1 = vpop.f32.mrf.mxu1 }
 0x192   :  { %v832_v37 = vpop.f32.mrf.mxu1 }
 0x193   :  { %2729 = vst.msk [vmem:[%s3885_s3 + $0x10] sm:$0x1f] %vm2726_vm2, %v832_v37 }
 0x194   :  { %v3117_v0 = vpop.f32.mrf.mxu1 }
 0x196   :  { %v902_v2 = vpop.f32.mrf.mxu1 }
 0x197   :  { %2730 = vst.msk [vmem:[%s3885_s3 + $0x18] sm:$0x1f] %vm2726_vm2, %v902_v2 }
 0x198   :  { %v3124_v3 = vpop.f32.mrf.mxu1 }
 0x19a   :  { %v972_v4 = vpop.f32.mrf.mxu1 }
 0x19b   :  { %2731 = vst.msk [vmem:[%s3885_s3 + $0x20] sm:$0x1f] %vm2726_vm2, %v972_v4 }
 0x19c   :  { %v3131_v5 = vpop.f32.mrf.mxu1 }
 0x19e   :  { %v1042_v6 = vpop.f32.mrf.mxu1 }
 0x19f   :  { %2732 = vst.msk [vmem:[%s3885_s3 + $0x28] sm:$0x1f] %vm2726_vm2, %v1042_v6 }
 0x1a0   :  { %v3138_v7 = vpop.f32.mrf.mxu1 }
 0x1a2   :  { %v1112_v8 = vpop.f32.mrf.mxu1 }
 0x1a3   :  { %2733 = vst.msk [vmem:[%s3885_s3 + $0x30] sm:$0x1f] %vm2726_vm2, %v1112_v8 }
 0x1a4   :  { %v3145_v9 = vpop.f32.mrf.mxu1 }
 0x1a6   :  { %v1182_v10 = vpop.f32.mrf.mxu1 }
 0x1a7   :  { %2734 = vst.msk [vmem:[%s3885_s3 + $0x38] sm:$0x1f] %vm2726_vm2, %v1182_v10 }
 0x1a8   :  { %v3152_v11 = vpop.f32.mrf.mxu1 }
 0x1aa   :  { %v1252_v12 = vpop.f32.mrf.mxu1 }
 0x1ab   :  { %2735 = vst.msk [vmem:[%s3885_s3 + $0x40] sm:$0x1f] %vm2726_vm2, %v1252_v12 }
 0x1ac   :  { %v3159_v13 = vpop.f32.mrf.mxu1 }
 0x1ae   :  { %v1322_v14 = vpop.f32.mrf.mxu1 }
 0x1af   :  { %2736 = vst.msk [vmem:[%s3885_s3 + $0x48] sm:$0x1f] %vm2726_vm2, %v1322_v14 }
 0x1b0   :  { %v3166_v15 = vpop.f32.mrf.mxu1 }
 0x1b2   :  { %v1392_v16 = vpop.f32.mrf.mxu1 }
 0x1b3   :  { %2737 = vst.msk [vmem:[%s3885_s3 + $0x50] sm:$0x1f] %vm2726_vm2, %v1392_v16 }
 0x1b4   :  { %v3173_v17 = vpop.f32.mrf.mxu1 }
 0x1b6   :  { %v1462_v18 = vpop.f32.mrf.mxu1 }
 0x1b7   :  { %2738 = vst.msk [vmem:[%s3885_s3 + $0x58] sm:$0x1f] %vm2726_vm2, %v1462_v18 }
 0x1b8   :  { %v3180_v19 = vpop.f32.mrf.mxu1 }
 0x1ba   :  { %v1532_v20 = vpop.f32.mrf.mxu1 }
 0x1bb   :  { %2739 = vst.msk [vmem:[%s3885_s3 + $0x60] sm:$0x1f] %vm2726_vm2, %v1532_v20 }
 0x1bc   :  { %v3187_v21 = vpop.f32.mrf.mxu1 }
 0x1be   :  { %v1602_v22 = vpop.f32.mrf.mxu1 }
 0x1bf   :  { %2740 = vst.msk [vmem:[%s3885_s3 + $0x68] sm:$0x1f] %vm2726_vm2, %v1602_v22 }
 0x1c0   :  { %v3194_v23 = vpop.f32.mrf.mxu1 }
 0x1c2   :  { %v1672_v24 = vpop.f32.mrf.mxu1 }
 0x1c3   :  { %2741 = vst.msk [vmem:[%s3885_s3 + $0x70] sm:$0x1f] %vm2726_vm2, %v1672_v24 }
 0x1c4   :  { %v3201_v25 = vpop.f32.mrf.mxu1 }
 0x1c6   :  { %v1742_v26 = vpop.f32.mrf.mxu1 }
 0x1c7   :  { %2742 = vst.msk [vmem:[%s3885_s3 + $0x78] sm:$0x1f] %vm2726_vm2, %v1742_v26 }
 0x1c8   :  { %v3208_v27 = vpop.f32.mrf.mxu1 }
 0x1ca   :  { %v1812_v28 = vpop.f32.mrf.mxu1 }
 0x1cb   :  { %2743 = vst.msk [vmem:[%s3885_s3 + $0x80] sm:$0x1f] %vm2726_vm2, %v1812_v28 }
 0x1cc   :  { %v3215_v29 = vpop.f32.mrf.mxu1 }
 0x1ce   :  { %v1882_v30 = vpop.f32.mrf.mxu1 }
 0x1cf   :  { %2744 = vst.msk [vmem:[%s3885_s3 + $0x88] sm:$0x1f] %vm2726_vm2, %v1882_v30 }
 0x1d0   :  { %v3222_v31 = vpop.f32.mrf.mxu1 }
 0x1d2   :  { %v1952_v32 = vpop.f32.mrf.mxu1 }
 0x1d3   :  { %2745 = vst.msk [vmem:[%s3885_s3 + $0x90] sm:$0x1f] %vm2726_vm2, %v1952_v32 }
 0x1d4   :  { %v3229_v33 = vpop.f32.mrf.mxu1 }
 0x1d6   :  { %v2022_v34 = vpop.f32.mrf.mxu1 }
 0x1d7   :  { %2746 = vst.msk [vmem:[%s3885_s3 + $0x98] sm:$0x1f] %vm2726_vm2, %v2022_v34 }
 0x1d8   :  { %v3236_v35 = vpop.f32.mrf.mxu1 }
 0x1da   :  { %v2092_v36 = vpop.f32.mrf.mxu1 }
 0x1db   :  { %2747 = vst.msk [vmem:[%s3885_s3 + $0xa0] sm:$0x1f] %vm2726_vm2, %v2092_v36 }
 0x1dc   :  { %v3243_v38 = vpop.f32.mrf.mxu1 }
 0x1de   :  { %v2162_v39 = vpop.f32.mrf.mxu1 }
 0x1df   :  { %2748 = vst.msk [vmem:[%s3885_s3 + $0xa8] sm:$0x1f] %vm2726_vm2, %v2162_v39 }
 0x1e0   :  { %v3250_v40 = vpop.f32.mrf.mxu1 }
 0x1e2   :  { %v2232_v41 = vpop.f32.mrf.mxu1 }
 0x1e3   :  { %2749 = vst.msk [vmem:[%s3885_s3 + $0xb0] sm:$0x1f] %vm2726_vm2, %v2232_v41 }
 0x1e4   :  { %v3257_v42 = vpop.f32.mrf.mxu1 }
 0x1e6   :  { %v2302_v43 = vpop.f32.mrf.mxu1 }
 0x1e7   :  { %2750 = vst.msk [vmem:[%s3885_s3 + $0xb8] sm:$0x1f] %vm2726_vm2, %v2302_v43 }
 0x1e8   :  { %v3264_v44 = vpop.f32.mrf.mxu1 }
 0x1ea   :  { %v2372_v45 = vpop.f32.mrf.mxu1 }
 0x1eb   :  { %2751 = vst.msk [vmem:[%s3885_s3 + $0xc0] sm:$0x1f] %vm2726_vm2, %v2372_v45 }
 0x1ec   :  { %v3271_v46 = vpop.f32.mrf.mxu1 }
 0x1ee   :  { %v2442_v47 = vpop.f32.mrf.mxu1 }
 0x1ef   :  { %2752 = vst.msk [vmem:[%s3885_s3 + $0xc8] sm:$0x1f] %vm2726_vm2, %v2442_v47 }
 0x1f0   :  { %v3278_v48 = vpop.f32.mrf.mxu1 }
 0x1f2   :  { %v2512_v49 = vpop.f32.mrf.mxu1 }
 0x1f3   :  { %2753 = vst.msk [vmem:[%s3885_s3 + $0xd0] sm:$0x1f] %vm2726_vm2, %v2512_v49 }
 0x1f4   :  { %v3285_v50 = vpop.f32.mrf.mxu1 }
 0x1f6   :  { %v2582_v51 = vpop.f32.mrf.mxu1 }
 0x1f7   :  { %2754 = vst.msk [vmem:[%s3885_s3 + $0xd8] sm:$0x1f] %vm2726_vm2, %v2582_v51 }
 0x1f8   :  { %v3292_v52 = vpop.f32.mrf.mxu1 }
 0x1fa   :  { %v2652_v53 = vpop.f32.mrf.mxu1 }
 0x1fb   :  { %2755 = vst.msk [vmem:[%s3885_s3 + $0xe0] sm:$0x1f] %vm2726_vm2, %v2652_v53 }
 0x1fc   :  { %v3299_v54 = vpop.f32.mrf.mxu1 }
 0x1fe   :  { %v2722_v55 = vpop.f32.mrf.mxu1 }
 0x1ff   :  { %2756 = vst.msk [vmem:[%s3885_s3 + $0xe8] sm:$0x1f] %vm2726_vm2, %v2722_v55 }
 0x200   :  { %v3306_v56 = vpop.f32.mrf.mxu1 }

</bundles_post_ra>
